<compile_context>
chip_gen: v5e
topology: v5e:2x2
jax: 0.10.0
libtpu: 0.0.40
codegen_flags: <defaults>
</compile_context>

<pallas_src>
import jax
import jax.numpy as jnp
from jax.experimental import pallas as pl
from jax.experimental.pallas import tpu as pltpu

_LANE = 128
_SUBLANE = 8


def _round_up(a, b):
    return (a + b - 1) // b * b


def _abs_diff_partial_kernel(x_ref, y_ref, o_ref):
    """Per-(i, j) partial sum of |x - y| over the row (sublane) axis only.

    x_ref: (TB, TL)    tile of the flattened x_output
    y_ref: (1, TL)     tile of the flattened label (broadcasts over rows)
    o_ref: (1, 1, TL)  f32 lane-dense partial sums for this grid point
    """
    x = x_ref[...].astype(jnp.float32)
    y = y_ref[...].astype(jnp.float32)
    d = jnp.abs(x - y)                                     # pure VPU elementwise
    # Fold only the non-lane (row) axis here; the full cross-lane reduction and the
    # divide by N*H*W happen once, outside the kernel.
    o_ref[...] = jnp.sum(d, axis=0, keepdims=True)[None]   # (1, 1, TL)


def skeleton_based_loss(x_output, y_labels, *, force_pallas=False,
                        target_block_bytes=4 * 1024 * 1024,
                        small_input_bytes=256 * 1024):
    """loss = mean(|x_output - y_labels[None]|), matching the PyTorch module.

    x_output: (N, H, W) float array
    y_labels: (H, W) array (the numpy label in the PyTorch code; cast to f32)
    """
    x = jnp.asarray(x_output)
    y = jnp.asarray(y_labels)
    if not jnp.issubdtype(x.dtype, jnp.floating):
        x = x.astype(jnp.float32)
    y = y.astype(jnp.float32)  # torch does label.float(); label is small, keep f32

    N, H, W = x.shape
    assert y.shape == (H, W)
    L = H * W
    total = N * L

    # Small-input fast path: pallas_call launch/pipeline overhead dominates.
    if (not force_pallas) and total * x.dtype.itemsize < small_input_bytes:
        return jnp.mean(jnp.abs(x.astype(jnp.float32) - y[None, :, :]))

    # ---- lane-dense 2-D layout + tiling ------------------------------------
    x2 = x.reshape(N, L)
    y2 = y.reshape(1, L)
    itemsize = x2.dtype.itemsize

    # Lane (column) tile: multiple of 128, capped so row chunks can stay large.
    tl = min(_round_up(L, _LANE), 256 * _LANE)
    l_pad = _round_up(L, tl)

    # Row (batch) tile: target ~target_block_bytes per x tile, multiple of 8.
    max_tb = max(_SUBLANE,
                 (target_block_bytes // (tl * itemsize)) // _SUBLANE * _SUBLANE)

    if _round_up(N, _SUBLANE) <= max_tb:
        # Single row chunk: block row-extent == full array extent (no row padding).
        tb, n_pad = N, N
    else:
        tb = max_tb
        n_pad = _round_up(N, tb)

    pad_cols = l_pad - L
    pad_rows = n_pad - N
    if pad_cols:
        # zero lane-padding on both x and y -> |0 - 0| = 0, no correction needed
        x2 = jnp.pad(x2, ((0, 0), (0, pad_cols)))
        y2 = jnp.pad(y2, ((0, 0), (0, pad_cols)))
    if pad_rows:
        # zero row-padding on x; each pad row contributes exactly sum(|y|) -> corrected below
        x2 = jnp.pad(x2, ((0, pad_rows), (0, 0)))

    num_i = n_pad // tb
    num_j = l_pad // tl

    partials = pl.pallas_call(
        _abs_diff_partial_kernel,
        out_shape=jax.ShapeDtypeStruct((num_i, 1, l_pad), jnp.float32),
        grid_spec=pltpu.PrefetchScalarGridSpec(
            num_scalar_prefetch=0,
            grid=(num_i, num_j),
            in_specs=[
                pl.BlockSpec((tb, tl), lambda i, j: (i, j)),   # x chunk
                pl.BlockSpec((1, tl), lambda i, j: (0, j)),    # label (row-invariant)
            ],
            out_specs=pl.BlockSpec((1, 1, tl), lambda i, j: (i, 0, j)),
        ),
        compiler_params=pltpu.CompilerParams(
            dimension_semantics=("parallel", "parallel"),
            vmem_limit_bytes=32 * 1024 * 1024,
        ),
    )(x2, y2)

    total_abs = jnp.sum(partials)
    if pad_rows:
        # remove the exactly-known contribution of the zero-padded rows: |0 - y| = |y|
        total_abs = total_abs - jnp.float32(pad_rows) * jnp.sum(jnp.abs(y2))
    return total_abs / jnp.float32(total)


if __name__ == "__main__":
    key = jax.random.PRNGKey(0)
    k1, k2, k3 = jax.random.split(key, 3)
    N, H, W = 2, 16, 16
    x_output = jax.random.normal(k1, (N, H, W), dtype=jnp.float32)
    y_labels = jax.random.normal(k2, (H, W), dtype=jnp.float32)

    # main test (single-chunk path)
    loss = skeleton_based_loss(x_output, y_labels, force_pallas=True)
    loss = jax.block_until_ready(loss)
    ref = jnp.mean(jnp.abs(x_output - y_labels[None, :, :]))
    assert jnp.allclose(loss, ref, rtol=1e-4, atol=1e-5), (loss, ref)

    # also exercise the multi-chunk / row-padding path with a tiny block budget
    x_big = jax.random.normal(k3, (20, H, W), dtype=jnp.float32)
    loss2 = skeleton_based_loss(x_big, y_labels, force_pallas=True,
                                target_block_bytes=8 * 1024)
    loss2 = jax.block_until_ready(loss2)
    ref2 = jnp.mean(jnp.abs(x_big - y_labels[None, :, :]))
    assert jnp.allclose(loss2, ref2, rtol=1e-4, atol=1e-5), (loss2, ref2)

    print("KERNEL_OK")
</pallas_src>

<mosaic_0001>
module attributes {stable_mosaic.version = 11 : i64} {
  func.func @_abs_diff_partial_kernel(%arg0: i32, %arg1: i32, %arg2: memref<2x256xf32, #tpu.memory_space<vmem>>, %arg3: memref<1x256xf32, #tpu.memory_space<vmem>>, %arg4: memref<1x1x256xf32, #tpu.memory_space<vmem>>) attributes {dimension_semantics = [#tpu.dimension_semantics<parallel>, #tpu.dimension_semantics<parallel>], iteration_bounds = array<i64: 1, 1>, scalar_prefetch = 0 : i64, scratch_operands = 0 : i64, tpu.core_type = #tpu.core_type<tc>, window_params = [{transform_indices = @transform_0, window_bounds = array<i64: 2, 256>}, {transform_indices = @transform_1, window_bounds = array<i64: 1, 256>}, {transform_indices = @transform_2, window_bounds = array<i64: 1, 1, 256>}]} {
    %c0 = arith.constant 0 : index
    %c0_0 = arith.constant 0 : index
    %0 = vector.load %arg2[%c0, %c0_0] : memref<2x256xf32, #tpu.memory_space<vmem>>, vector<2x256xf32>
    %c0_1 = arith.constant 0 : index
    %c0_2 = arith.constant 0 : index
    %1 = vector.load %arg3[%c0_1, %c0_2] : memref<1x256xf32, #tpu.memory_space<vmem>>, vector<1x256xf32>
    %2 = vector.broadcast %1 : vector<1x256xf32> to vector<2x256xf32>
    %3 = arith.subf %0, %2 : vector<2x256xf32>
    %4 = math.absf %3 : vector<2x256xf32>
    %cst = arith.constant dense<0.000000e+00> : vector<256xf32>
    %5 = vector.multi_reduction <add>, %4, %cst [0] : vector<2x256xf32> to vector<256xf32>
    %6 = vector.shape_cast %5 : vector<256xf32> to vector<1x256xf32>
    %7 = vector.shape_cast %6 : vector<1x256xf32> to vector<1x1x256xf32>
    %c0_3 = arith.constant 0 : index
    %c0_4 = arith.constant 0 : index
    %c0_5 = arith.constant 0 : index
    %8 = vector.load %arg4[%c0_3, %c0_4, %c0_5] : memref<1x1x256xf32, #tpu.memory_space<vmem>>, vector<1x1x256xf32>
    tpu.vector_store %arg4[%c0_3, %c0_4, %c0_5], %7 {strides = array<i32>} : memref<1x1x256xf32, #tpu.memory_space<vmem>>, vector<1x1x256xf32>,
    return
  }
  func.func @transform_0(%arg0: i32, %arg1: i32) -> (i32, i32) {
    %c0_i32 = arith.constant 0 : i32
    return %arg0, %arg1 : i32, i32
  }
  func.func @transform_1(%arg0: i32, %arg1: i32) -> (i32, i32) {
    %c0_i32 = arith.constant 0 : i32
    %c0_i32_0 = arith.constant 0 : i32
    return %c0_i32, %arg1 : i32, i32
  }
  func.func @transform_2(%arg0: i32, %arg1: i32) -> (i32, i32, i32) {
    %c0_i32 = arith.constant 0 : i32
    %c0_i32_0 = arith.constant 0 : i32
    return %arg0, %c0_i32, %arg1 : i32, i32, i32
  }
}

</mosaic_0001>

<bundles_post_ra>
// kernel: tpu_custom_call.1
= control target key start
LH: loop header
LB: loop body
LE: loop exit
PB: predicated region body
PF: predicated region fallthrough
CT: control target
= control target key end

     0   :  { %7 = vsyncpa [#allocation3], 0  ;;  %s208_s0 = inlined_call_operand.hbm [shape: f32[2,256], index: 0, kind: input, shape index: {}]   ;;  %s209_s1 = inlined_call_operand.hbm [shape: f32[1,256], index: 1, kind: input, shape index: {}]   ;;  %s210_s2 = inlined_call_operand.hbm [shape: f32[1,1,256], index: 2, kind: output, shape index: {}]  }
   0x1   :  { %8 = vsyncpa [#allocation6], 0 }
   0x2   :  { %9 = vsyncpa [#allocation4], 0  ;;  %s15_s11 = sshll.u32 %s208_s0, 4  ;;  %s181_s12 = smov [#allocation2]   ;;  %s16_s11 = int_to_ptr.hbm [resolvable:$true] %s15_s11 }
   0x3   :  { %s17_s13 = sshll.u32 %s181_s12, 4  ;;  %s26_s16 = sshll.u32 %s209_s1, 4  ;;  %s18_s13 = int_to_ptr.vmem [resolvable:$true] %s17_s13  ;;  %s27_s16 = int_to_ptr.hbm [resolvable:$true] %s26_s16 }
   0x4   :  { %20 = dma.hbm_to_vmem [thread:$0]  %s16_s11, 64, %s18_s13, [#allocation3]  }
   0x5   :  { %s182_s17 = smov [#allocation5]  }
   0x6   :  { %s28_s18 = sshll.u32 %s182_s17, 4  ;;  %s29_s18 = int_to_ptr.vmem [resolvable:$true] %s28_s18 }
   0x7   :  { %31 = dma.hbm_to_vmem [thread:$0]  %s27_s16, 32, %s29_s18, [#allocation6]  }
   0x8   :  { %175 = dma.done.wait [#allocation3], 64  }
   0x9   :  { %176 = vsyncadd [#allocation3], 4294967232 }
   0xa   :  { %177 = dma.done.wait [#allocation6], 32  }
   0xb   :  { %178 = vsyncadd [#allocation6], 4294967264  ;;  %v41_v0 = vld [vmem:[#allocation5] sm:$0x3]  ;;  %vm46_vm0 = vcmask 1041408   ;;  %v77_v22 = vlaneseq  ;;  %s183_s0 = smov [#allocation7]  }
   0xc   :  { %v43_v1 = vperm.slane %v41_v0, 0  ;;  %v44_v2 = vperm.slane %v41_v0, 1  ;;  %v40_v3 = vld [vmem:[#allocation2] sm:$0xf]  ;;  %s87_s1 = sshll.u32 %s183_s0, 4  ;;  %s89_s21 = sshll.u32 %s210_s2, 4  ;;  %s88_s1 = int_to_ptr.vmem [resolvable:$true] %s87_s1  ;;  %s90_s21 = int_to_ptr.hbm [resolvable:$true] %s89_s21 }
   0xd   :  { %vm74_vm1 = vcmask 1040384   ;;  %vm79_vm2 = vcmp.lt.s32.totalorder %v77_v22, 256 }
   0xe   :  { %v45_v4 = vrot.slane %v44_v2, 6 }
  0x10   :  { %v47_v5 = vsel %vm46_vm0, %v43_v1, %v45_v4 }
  0x11   :  { %v49_v6 = vsub.f32 %v40_v3, %v47_v5 }
  0x13   :  { %v50_v7 = vand.u32 2147483647, %v49_v6 }
  0x15   :  { %52 = vst [vmem:[#allocation1] ss:$4 sm:$0xff] %v50_v7 }
  0x1c   :  { %v53_v8 = vld.sshfl [vmem:[#allocation1] sm:$0xff pattern:$0x73625140]  ;;  %v54_v9 = vld.sshfl [vmem:[#allocation1 + $0x8] sm:$0xff pattern:$0x73625140] }
  0x1d   :  { %v57_v10 = vsel %vm46_vm0, %v53_v8, 0.0  ;;  %v64_v11 = vsel %vm46_vm0, %v54_v9, 0.0 }
  0x1e   :  { %v58_v12 = vrot.slane %v57_v10, 4  ;;  %v65_v13 = vrot.slane %v64_v11, 4 }
  0x20   :  { %v59_v14 = vadd.f32 %v58_v12, %v57_v10  ;;  %v66_v15 = vadd.f32 %v65_v13, %v64_v11 }
  0x22   :  { %v67_v16 = vrot.slane %v66_v15, 2  ;;  %v60_v17 = vrot.slane %v59_v14, 2 }
  0x24   :  { %v61_v18 = vadd.f32 %v60_v17, %v59_v14  ;;  %v68_v19 = vadd.f32 %v67_v16, %v66_v15 }
  0x26   :  { %v62_v20 = vrot.slane %v61_v18, 1  ;;  %v69_v21 = vrot.slane %v68_v19, 1 }
  0x28   :  { %v70_v23 = vadd.f32 %v69_v21, %v68_v19  ;;  %v63_v24 = vadd.f32 %v62_v20, %v61_v18 }
  0x2a   :  { %v73_v25 = vrot.slane %v70_v23, 7 }
  0x2c   :  { %v75_v26 = vsel %vm74_vm1, %v63_v24, %v73_v25 }
  0x2d   :  { %81 = vst.msk [vmem:[#allocation7] sm:$0x3] %vm79_vm2, %v75_v26 }
  0x2e   :  { %92 = dma.vmem_to_hbm [thread:$0]  %s88_s1, 32, %s90_s21, [#allocation4]  }
  0x2f   :  { %179 = dma.done.wait [#allocation4], 32  }
  0x30   :  { %180 = vsyncadd [#allocation4], 4294967264 }
  0x31   :  { %97 = vsyncpa [#allocation3], 1 }
  0x32   :  { %98 = vsyncpa [#allocation6], 1 }
  0x33   :  { %99 = vsyncpa [#allocation4], 1 }

</bundles_post_ra>
